<compile_context>
chip_gen: v5e
topology: v5e:2x2
jax: 0.10.0
libtpu: 0.0.40
codegen_flags: <defaults>
</compile_context>

<pallas_src>
import jax
import jax.numpy as jnp
from jax.experimental import pallas as pl
from jax.experimental.pallas import tpu as pltpu

_LANES = 128
_TARGET_TILE_ROWS = 512      # DMA-efficiency target (~85% of HBM roofline on v6e)
_VREG_SLICE_BUDGET = 40      # max live channel-slice vregs per in-kernel chunk


def _cdiv(a: int, b: int) -> int:
    return -(-a // b)


def _median_of_slices(vals):
    """Lower median of a static list of equal-shaped arrays via min/max only."""
    C = len(vals)
    m = (C - 1) // 2
    if C == 1:
        return vals[0]
    if C == 2:
        return jnp.minimum(vals[0], vals[1])
    if C == 3:
        lo = jnp.minimum(vals[0], vals[1])
        hi = jnp.maximum(vals[0], vals[1])
        return jnp.maximum(lo, jnp.minimum(hi, vals[2]))
    if C == 4:
        # Lower-median-of-4 in 7 min/max ops.
        lo1 = jnp.minimum(vals[0], vals[1])
        hi1 = jnp.maximum(vals[0], vals[1])
        lo2 = jnp.minimum(vals[2], vals[3])
        hi2 = jnp.maximum(vals[2], vals[3])
        return jnp.minimum(jnp.maximum(lo1, lo2), jnp.minimum(hi1, hi2))
    vals = list(vals)
    # Truncated bubble / selection network: pass i bubbles the max of the
    # unsorted prefix into position C-1-i.  After C-m-1 full passes the m+1
    # smallest values live (unordered) in vals[0..m]; the final pass reduces
    # to a pure max-chain over them (its min writes would be dead).
    for i in range(C - m - 1):
        for j in range(C - 1 - i):
            a = vals[j]
            b = vals[j + 1]
            vals[j] = jnp.minimum(a, b)
            vals[j + 1] = jnp.maximum(a, b)
    med = vals[0]
    for j in range(1, m + 1):
        med = jnp.maximum(med, vals[j])
    return med


def _median_ops_per_elem(C: int) -> int:
    m = (C - 1) // 2
    if C <= 2:
        return max(C - 1, 0)
    if C == 3:
        return 4
    if C == 4:
        return 7
    return 2 * sum(C - 1 - i for i in range(C - m - 1)) + m


def _make_median_kernel(C: int, chunk_rows: int, n_chunks: int):
    def _do_chunk(x_ref, o_ref, rows):
        vals = [x_ref[0, c, rows, :] for c in range(C)]
        o_ref[0, rows, :] = _median_of_slices(vals)

    def kernel(x_ref, o_ref):
        # x_ref: (1, C, tile_rows, 128) VMEM block; o_ref: (1, tile_rows, 128).
        if n_chunks == 1:
            _do_chunk(x_ref, o_ref, slice(None))
        else:
            def body(ci, carry):
                r0 = pl.multiple_of(ci * chunk_rows, chunk_rows)
                _do_chunk(x_ref, o_ref, pl.ds(r0, chunk_rows))
                return carry

            jax.lax.fori_loop(0, n_chunks, body, 0, unroll=(n_chunks <= 8))

    return kernel


def median_dim1(x: jax.Array) -> jax.Array:
    """Equivalent of torch.median(x, dim=1)[0] for a 4D NCHW tensor."""
    N, C, H, W = x.shape
    HW = H * W
    dtype = x.dtype
    itemsize = jnp.dtype(dtype).itemsize

    # --- Per-chip VMEM sizing --------------------------------------------
    try:
        vmem_cap = int(pltpu.get_tpu_info().vmem_capacity_bytes)
    except Exception:
        vmem_cap = 64 * 1024 * 1024          # v7x-safe fallback
    vmem_limit = min((vmem_cap * 3) // 4, 96 * 1024 * 1024)
    vmem_budget = (vmem_limit * 3) // 5      # headroom for compiler scratch

    # --- Lane-dense layout: flatten spatial into (rows, 128) --------------
    R = _cdiv(HW, _LANES)
    hw_pad = R * _LANES
    xf = x.reshape(N, C, HW)
    if hw_pad != HW:
        # Only the sub-128-lane tail is padded; padded lanes produce garbage
        # medians that are sliced off below (channels are never mixed).
        xf = jnp.pad(xf, ((0, 0), (0, 0), (0, hw_pad - HW)))
    xr = xf.reshape(N, C, R, _LANES)

    # --- Chunk (vreg) and tile (DMA) sizing --------------------------------
    # Minimum sublane multiple per dtype packing (f32:8, bf16:16, int8:32).
    sub = {4: 8, 2: 16, 1: 32}.get(itemsize, 8)
    # Rows per in-kernel chunk so the C live channel slices stay under
    # ~_VREG_SLICE_BUDGET 32-bit vregs (f32-conservative: also safe on v5e
    # where bf16 min/max is computed in f32).
    chunk_rows = max(sub, ((_VREG_SLICE_BUDGET * 8) // max(C, 1)) // sub * sub)

    if R <= chunk_rows:
        tile_rows = R            # equals the full row extent -> no (8,128) rule
        chunk_rows = R
        n_chunks = 1
    else:
        max_rows_vmem = vmem_budget // (2 * (C + 1) * _LANES * itemsize)
        max_rows_vmem = max(chunk_rows, (max_rows_vmem // chunk_rows) * chunk_rows)
        tile_rows = min(
            max(chunk_rows, (_TARGET_TILE_ROWS // chunk_rows) * chunk_rows),
            max_rows_vmem,
            chunk_rows * _cdiv(R, chunk_rows),
        )
        n_chunks = tile_rows // chunk_rows

    n_tiles = _cdiv(R, tile_rows)

    # Megacore (v7x): guarantee >=2 parallel grid steps when possible.
    if N == 1 and n_tiles == 1 and n_chunks >= 2:
        n_chunks = _cdiv(n_chunks, 2)
        tile_rows = chunk_rows * n_chunks
        n_tiles = _cdiv(R, tile_rows)

    # --- Cost hint for the XLA scheduler -----------------------------------
    cost = pl.CostEstimate(
        flops=_median_ops_per_elem(C) * N * HW,
        transcendentals=0,
        bytes_accessed=(N * C * HW + N * HW) * itemsize,
    )

    kernel = _make_median_kernel(C, chunk_rows, n_chunks)

    out = pl.pallas_call(
        kernel,
        out_shape=jax.ShapeDtypeStruct((N, R, _LANES), dtype),
        grid_spec=pltpu.PrefetchScalarGridSpec(
            num_scalar_prefetch=0,
            grid=(N, n_tiles),
            in_specs=[
                pl.BlockSpec((1, C, tile_rows, _LANES),
                             lambda n, t: (n, 0, t, 0)),
            ],
            out_specs=pl.BlockSpec((1, tile_rows, _LANES),
                                   lambda n, t: (n, t, 0)),
        ),
        compiler_params=pltpu.CompilerParams(
            # Both axes are independent -> shardable across TCs (v7x megacore).
            dimension_semantics=("parallel", "parallel"),
            vmem_limit_bytes=vmem_limit,
        ),
        cost_estimate=cost,
    )(xr)

    out_flat = out.reshape(N, hw_pad)
    if hw_pad != HW:
        out_flat = out_flat[:, :HW]
    return out_flat.reshape(N, H, W)


if __name__ == "__main__":
    key = jax.random.PRNGKey(0)
    # Small NCHW activation: batch=2, channels=4, 16x16 spatial.
    x = jax.random.normal(key, (2, 4, 16, 16), dtype=jnp.float32)

    out = jax.block_until_ready(median_dim1(x))

    # Reference: lower median along axis 1.
    C = x.shape[1]
    ref = jnp.sort(x, axis=1)[:, (C - 1) // 2, :, :]

    assert out.shape == (2, 16, 16), out.shape
    assert out.dtype == x.dtype
    assert jnp.allclose(out, ref), "mismatch vs. reference median"

    print("KERNEL_OK")
</pallas_src>

<mosaic_0001>
module attributes {stable_mosaic.version = 11 : i64} {
  func.func @kernel(%arg0: i32, %arg1: i32, %arg2: memref<1x4x2x128xf32, #tpu.memory_space<vmem>>, %arg3: memref<1x2x128xf32, #tpu.memory_space<vmem>>) attributes {dimension_semantics = [#tpu.dimension_semantics<parallel>, #tpu.dimension_semantics<parallel>], iteration_bounds = array<i64: 2, 1>, scalar_prefetch = 0 : i64, scratch_operands = 0 : i64, tpu.core_type = #tpu.core_type<tc>, window_params = [{transform_indices = @transform_0, window_bounds = array<i64: 1, 4, 2, 128>}, {transform_indices = @transform_1, window_bounds = array<i64: 1, 2, 128>}]} {
    %c0 = arith.constant 0 : index
    %c0_0 = arith.constant 0 : index
    %c0_1 = arith.constant 0 : index
    %c0_2 = arith.constant 0 : index
    %0 = vector.load %arg2[%c0, %c0_0, %c0_1, %c0_2] : memref<1x4x2x128xf32, #tpu.memory_space<vmem>>, vector<1x1x2x128xf32>
    %1 = vector.shape_cast %0 : vector<1x1x2x128xf32> to vector<2x128xf32>
    %c0_3 = arith.constant 0 : index
    %c1 = arith.constant 1 : index
    %c0_4 = arith.constant 0 : index
    %c0_5 = arith.constant 0 : index
    %2 = vector.load %arg2[%c0_3, %c1, %c0_4, %c0_5] : memref<1x4x2x128xf32, #tpu.memory_space<vmem>>, vector<1x1x2x128xf32>
    %3 = vector.shape_cast %2 : vector<1x1x2x128xf32> to vector<2x128xf32>
    %c0_6 = arith.constant 0 : index
    %c2 = arith.constant 2 : index
    %c0_7 = arith.constant 0 : index
    %c0_8 = arith.constant 0 : index
    %4 = vector.load %arg2[%c0_6, %c2, %c0_7, %c0_8] : memref<1x4x2x128xf32, #tpu.memory_space<vmem>>, vector<1x1x2x128xf32>
    %5 = vector.shape_cast %4 : vector<1x1x2x128xf32> to vector<2x128xf32>
    %c0_9 = arith.constant 0 : index
    %c3 = arith.constant 3 : index
    %c0_10 = arith.constant 0 : index
    %c0_11 = arith.constant 0 : index
    %6 = vector.load %arg2[%c0_9, %c3, %c0_10, %c0_11] : memref<1x4x2x128xf32, #tpu.memory_space<vmem>>, vector<1x1x2x128xf32>
    %7 = vector.shape_cast %6 : vector<1x1x2x128xf32> to vector<2x128xf32>
    %8 = arith.minimumf %1, %3 : vector<2x128xf32>
    %9 = arith.maximumf %1, %3 : vector<2x128xf32>
    %10 = arith.minimumf %5, %7 : vector<2x128xf32>
    %11 = arith.maximumf %5, %7 : vector<2x128xf32>
    %12 = arith.maximumf %8, %10 : vector<2x128xf32>
    %13 = arith.minimumf %9, %11 : vector<2x128xf32>
    %14 = arith.minimumf %12, %13 : vector<2x128xf32>
    %c0_12 = arith.constant 0 : index
    %c0_13 = arith.constant 0 : index
    %c0_14 = arith.constant 0 : index
    %15 = vector.load %arg3[%c0_12, %c0_13, %c0_14] : memref<1x2x128xf32, #tpu.memory_space<vmem>>, vector<1x2x128xf32>
    %16 = vector.shape_cast %15 : vector<1x2x128xf32> to vector<2x128xf32>
    %17 = vector.shape_cast %14 : vector<2x128xf32> to vector<1x2x128xf32>
    tpu.vector_store %arg3[%c0_12, %c0_13, %c0_14], %17 {strides = array<i32>} : memref<1x2x128xf32, #tpu.memory_space<vmem>>, vector<1x2x128xf32>,
    return
  }
  func.func @transform_0(%arg0: i32, %arg1: i32) -> (i32, i32, i32, i32) {
    %c0_i32 = arith.constant 0 : i32
    %c0_i32_0 = arith.constant 0 : i32
    %c0_i32_1 = arith.constant 0 : i32
    return %arg0, %c0_i32, %arg1, %c0_i32_0 : i32, i32, i32, i32
  }
  func.func @transform_1(%arg0: i32, %arg1: i32) -> (i32, i32, i32) {
    %c0_i32 = arith.constant 0 : i32
    %c0_i32_0 = arith.constant 0 : i32
    return %arg0, %arg1, %c0_i32 : i32, i32, i32
  }
}

</mosaic_0001>

<bundles_post_ra>
// kernel: tpu_custom_call.1
= control target key start
LH: loop header
LB: loop body
LE: loop exit
PB: predicated region body
PF: predicated region fallthrough
CT: control target
= control target key end

     0   :  { %6 = vsyncpa [#allocation3], 0  ;;  %s596_s0 = inlined_call_operand.hbm [shape: f32[2,4,2,128], index: 0, kind: input, shape index: {}]   ;;  %s597_s1 = inlined_call_operand.hbm [shape: f32[2,2,128], index: 1, kind: output, shape index: {}]  }
   0x1   :  { %8 = vsyncpa [#allocation3 + $0x1], 0 }
   0x2   :  { %9 = vsyncpa [#allocation4], 0 }
   0x3   :  { %11 = vsyncpa [#allocation4 + $0x1], 0  ;;  %s475_s6 = smov 0   ;;  %s477_s7 = smov 0  }
   0x4   :  { %s479_s8 = smov 0   ;;  %s481_s9 = smov 0  }
   0x5   :  { %s483_s10 = smov 0   ;;  %s485_s11 = smov 0  }
   0x6 LB: > { %s267_s12 = sadd.s32 4294967295, %s461_s11   ;;  %s268_s13 = sadd.s32 4294967294, %s461_s11   ;;  %s461_s11 = sphi %s485_s11, %s17_s11   ;;  %s457_s10 = sphi %s483_s10, %s606_s10   ;;  %s453_s9 = sphi %s481_s9, %s605_s9   ;;  %s449_s8 = sphi %s479_s8, %s604_s8   ;;  %s445_s7 = sphi %s477_s7, %s603_s7   ;;  %s441_s6 = sphi %s475_s6, %s602_s6  }
   0x7   : > { %s29_s14 = sadd.s32 1, %s457_s10  ;;  %s38_s15 = sadd.s32 1, %s449_s8 }
   0x8   : > { %p31_p0 = scmp.ge.s32.totalorder %s29_s14, 2  ;;  %p45_p1 = scmp.ne.s32.totalorder %s449_s8, %s445_s7 }
   0x9   : > { %p46_p2 = scmp.eq.s32.totalorder %s461_s11, 0  ;;  %p51_p3 = scmp.ne.s32.totalorder %s445_s7, %s441_s6 }
   0xa   : > { %s608_s14 = smov (%p31_p0, %s29_s14), 0  ;;  %p52_p5 = scmp.eq.s32.totalorder %s267_s12, 0 }
   0xb   : > { %p516_p4 = por %p46_p2, %p45_p1  ;;  %s33_s17 = ssub.s32 %s457_s10, %s608_s14 }
   0xc   : > { %p77_p6 = scmp.eq.s32.totalorder %s267_s12, 1  ;;  %p36_p7 = scmp.eq.s32.totalorder %s33_s17, 0 }
   0xd   : > { %p522_p8 = por %p52_p5, %p51_p3  ;;  %p83_p10 = scmp.eq.s32.totalorder %s268_s13, 1 }
   0xe   : > { %p526_p9 = por %p77_p6, %p45_p1  ;;  %p270_p12 = scmp.ge.s32.totalorder %s461_s11, 2 }
   0xf   : > { %s531_s20 = scalar_select %p36_p7, %s449_s8, %s38_s15  }
  0x10   : > { %p533_p11 = por %p83_p10, %p51_p3  ;;  %p297_p13 = scmp.lt.s32.totalorder %s461_s11, 2 }
  0x11   : > { %s103_s22 = sand.u32 1, %s449_s8   ;;  %s284_s24 = sshll.u32 %s457_s10, 3 }
  0x12   : > { %s271_s23 = sshll.u32 %s103_s22, 3  ;;  %s113_s27 = scalar_lea.hbm %s596_s0, %s284_s24 }
  0x13   : > { %s107_s28 = scalar_lea.vmem [#allocation2], %s271_s23  ;;  %s114_s30 = sshll.u32 %s113_s27, 4  ;;  %s115_s30 = int_to_ptr.hbm [resolvable:$true] %s114_s30 }
  0x14   : > { %s116_s29 = sshll.u32 %s107_s28, 4  ;;  %p290_p0 = pnand %p297_p13, %p516_p4  ;;  %s117_s29 = int_to_ptr.vmem [resolvable:$true] %s116_s29 }
  0x15   : > { %p274_p1 = scmp.ge.s32.totalorder %s461_s11, 1  ;;  %s104_s2 = scalar_lea.sflag [#allocation3], %s103_s22 }
  0x16   : > { %s463_s3 = smov 32   ;;  %s464_s4 = smov 2  }
  0x17   : > { %292 = dma.hbm_to_vmem [thread:$0]  (!%p290_p0), %s115_s30, 128, %s117_s29, %s104_s2, %s463_s3, %s463_s3, %s464_s4  }
  0x18   : > { %p124_p2 = scmp.lt.s32.totalorder %s461_s11, 3 }
  0x1a   : > { %p125_p3 = pnand %p274_p1, %p124_p2 }
  0x1b   : > { %s549_s5 = sand.u32 (!%p125_p3), 1, %s445_s7  }
  0x1c   : > { %128 = sbr.rel (%p125_p3) target bundleno = 50 (0x32), region = 24  ;;  %s275_s12 = sshll.u32 (!%p125_p3), %s549_s5, 3 }
  0x1d   : > { %s131_s13 = scalar_lea.sflag (!%p125_p3), [#allocation3], %s549_s5  ;;  %s134_s15 = scalar_lea.vmem (!%p125_p3), [#allocation2], %s275_s12 }
  0x21   : > { %432 = dma.done.wait (%p522_p8), %s131_s13, 128  }
  0x22   : > { %434 = vsyncadd (%p522_p8), %s131_s13, 4294967168  ;;  %s276_s16 = sshll.u32 %s549_s5, 1  ;;  %s281_s17 = sshll.u32 %s453_s9, 1  ;;  %v154_v0 = vld [vmem:[%s134_s15] sm:$0x3] }
  0x23   : > { %v277_v1 = vld [vmem:[%s134_s15 + $0x2] sm:$0x3]  ;;  %v278_v2 = vld [vmem:[%s134_s15 + $0x4] sm:$0x3]  ;;  %s181_s24 = scalar_lea.hbm %s597_s1, %s281_s17  ;;  %v279_v3 = vld [vmem:[%s134_s15 + $0x6] sm:$0x3] }
  0x24   : > { %v161_v4 = vmin.f32 %v154_v0, %v277_v1  ;;  %v162_v5 = vmax.f32 %v154_v0, %v277_v1  ;;  %v163_v6 = vmin.f32 %v278_v2, %v279_v3  ;;  %v164_v7 = vmax.f32 %v278_v2, %v279_v3  ;;  %s153_s18 = scalar_lea.vmem [#allocation5], %s276_s16  ;;  %s185_s26 = sshll.u32 %s181_s24, 4  ;;  %s186_s26 = int_to_ptr.hbm [resolvable:$true] %s185_s26 }
  0x25   : > { %s183_s25 = sshll.u32 %s153_s18, 4  ;;  %s170_s9 = scalar_lea.sflag [#allocation4], %s549_s5  ;;  %s184_s25 = int_to_ptr.vmem [resolvable:$true] %s183_s25 }
  0x26   : > { %v165_v8 = vmax.f32 %v161_v4, %v163_v6  ;;  %v166_v9 = vmin.f32 %v162_v5, %v164_v7  ;;  %s393_s27 = sshra.s32 %s186_s26, 4  ;;  %s399_s2 = scalar_lea.hbm %s597_s1, 4  ;;  %s394_s27 = int_to_ptr.hbm [resolvable:$true] %s393_s27 }
  0x27   : > { %s395_s28 = scalar_lea.hbm %s394_s27, 2  ;;  %p400_p7 = scmp.lt.s32.totalorder %s394_s27, %s597_s1 }
  0x28   : > { %v167_v10 = vmin.f32 %v165_v8, %v166_v9  ;;  %p396_p4 = scmp.ne.s32.totalorder %s394_s27, %s395_s28  ;;  %p401_p8 = scmp.lt.s32.totalorder %s399_s2, %s395_s28 }
  0x2a   : > { %168 = vst [vmem:[%s153_s18] sm:$0x3] %v167_v10  ;;  %p397_p5 = pnand %p396_p4, %p526_p9  ;;  %p402_p10 = por %p401_p8, %p400_p7 }
  0x2c   : > { %p398_p6 = pneg %p397_p5 }
  0x2e   : > { %p403_p13 = pnand %p402_p10, %p398_p6 }
  0x30   : > { %406 = shalt.err (!%p403_p13)
}
  0x31   : > { %287 = dma.vmem_to_hbm [thread:$0]  (%p526_p9), %s184_s25, 32, %s186_s26, %s170_s9  }
  0x32 PF: > { %s197_s5 = sand.u32 1, %s441_s6   ;;  %p294_p0 = pnand %p270_p12, %p533_p11 }
  0x33   : > { %s198_s12 = scalar_lea.sflag [#allocation4], %s197_s5 }
  0x34   : > { %p295_p1 = pneg %p294_p0 }
  0x36   : > { %436 = dma.done.wait (%p295_p1), %s198_s12, 32  }
  0x37   : > { %438 = vsyncadd (%p295_p1), %s198_s12, 4294967264  ;;  %s17_s11 = sadd.s32 1, %s461_s11   ;;  %s602_s6 = smov %s445_s7 }
  0x38   : > { %p14_p2 = scmp.ge.s32.totalorder %s17_s11, 4   ;;  %s603_s7 = smov %s449_s8 }
  0x39   : > { %s604_s8 = smov %s531_s20  ;;  %s605_s9 = smov %s457_s10 }
  0x3a   : > { %s606_s10 = smov %s608_s14  ;;  %16 = sbr.rel (!%p14_p2) target bundleno = 6 (0x6), region = 72 }
  0x3f   :  { %204 = vsyncpa [#allocation3], 1 }
  0x40   :  { %206 = vsyncpa [#allocation3 + $0x1], 1 }
  0x41   :  { %207 = vsyncpa [#allocation4], 1 }
  0x42   :  { %209 = vsyncpa [#allocation4 + $0x1], 1 }

</bundles_post_ra>
